<compile_context>
chip_gen: v5e
topology: v5e:2x2
jax: 0.10.0
libtpu: 0.0.40
codegen_flags: <defaults>
</compile_context>

<pallas_src>
import jax
import jax.numpy as jnp
from jax.experimental import pallas as pl
from jax.experimental.pallas import tpu as pltpu


def _make_rnn_kernel(n_layers, batch, seq, h_dim, out_dim):
    def kernel(*refs):
        x_ref = refs[0]
        layer_refs = refs[1:1 + 4 * n_layers]
        wout_ref, bout_ref, h0_ref = refs[1 + 4 * n_layers:4 + 4 * n_layers]
        y_ref, hn_ref = refs[4 + 4 * n_layers:6 + 4 * n_layers]
        hseq_scr = refs[6 + 4 * n_layers]          # (B, T, H) VMEM scratch

        seq_val = x_ref[...]                       # (B, T, D_in) — current layer input
        for l in range(n_layers):
            w_ih = layer_refs[4 * l + 0][...]      # (D_l, H)
            w_hh = layer_refs[4 * l + 1][...]      # (H, H)  (loaded once per layer)
            b_ih = layer_refs[4 * l + 2][...]      # (1, H)
            b_hh = layer_refs[4 * l + 3][...]      # (1, H)
            d_l = seq_val.shape[-1]

            # Hoisted input projection for all (batch, time) positions at once.
            xw = jnp.dot(seq_val.reshape(batch * seq, d_l), w_ih,
                         preferred_element_type=jnp.float32) + b_ih + b_hh
            xw = xw.reshape(batch, seq, h_dim)

            # Fully-unrolled recurrence; h stays in vregs across steps.
            h = h0_ref[l]                          # (B, H)
            for t in range(seq):
                h = jnp.tanh(xw[:, t, :] +
                             jnp.dot(h, w_hh, preferred_element_type=jnp.float32))
                # Store h_t for the hoisted output projection / next layer
                # (store is off the recurrence critical path).
                hseq_scr[:, pl.ds(t, 1), :] = h.reshape(batch, 1, h_dim)
            hn_ref[l] = h
            seq_val = hseq_scr[...]                # (B, T, H) input to next layer

        # Hoisted output projection: one matmul + one store for the whole sequence.
        y = jnp.dot(seq_val.reshape(batch * seq, h_dim), wout_ref[...],
                    preferred_element_type=jnp.float32) + bout_ref[...]
        y_ref[...] = y.reshape(batch, seq, out_dim)

    return kernel


def high_level_rnn_forward(x, h_state, params):
    """Mirrors HighLevelRNN.forward.

    x:       (batch, time, in_dim) f32
    h_state: (n_layers, batch, h_dim) f32
    returns (y_hat (batch, time, out_dim), h_state (n_layers, batch, h_dim))
    """
    rnn_layers, w_out, b_out = params
    n_layers = len(rnn_layers)
    batch, seq, _ = x.shape
    h_dim = rnn_layers[0][1].shape[0]
    out_dim = w_out.shape[1]

    flat_w = []
    for (w_ih, w_hh, b_ih, b_hh) in rnn_layers:
        flat_w += [w_ih, w_hh, b_ih.reshape(1, h_dim), b_hh.reshape(1, h_dim)]

    vmem = pl.BlockSpec(memory_space=pltpu.MemorySpace.VMEM)
    kernel = _make_rnn_kernel(n_layers, batch, seq, h_dim, out_dim)

    y, h_n = pl.pallas_call(
        kernel,
        out_shape=(
            jax.ShapeDtypeStruct((batch, seq, out_dim), jnp.float32),
            jax.ShapeDtypeStruct((n_layers, batch, h_dim), jnp.float32),
        ),
        in_specs=[vmem] * (4 * n_layers + 4),
        out_specs=(vmem, vmem),
        scratch_shapes=[pltpu.VMEM((batch, seq, h_dim), jnp.float32)],
    )(x, *flat_w, w_out, b_out.reshape(1, out_dim), h_state)
    return y, h_n


def init_params(key, in_dim, h_dim, out_dim, n_layers):
    # PyTorch-style uniform(-1/sqrt(h_dim), 1/sqrt(h_dim)); weights stored as
    # (in, out) so the kernel computes x @ W directly (math-equivalent to W^T).
    scale = 1.0 / (h_dim ** 0.5)
    keys = jax.random.split(key, 4 * n_layers + 2)
    ki = 0
    layers = []
    d = in_dim
    for _ in range(n_layers):
        w_ih = jax.random.uniform(keys[ki], (d, h_dim), jnp.float32, -scale, scale); ki += 1
        w_hh = jax.random.uniform(keys[ki], (h_dim, h_dim), jnp.float32, -scale, scale); ki += 1
        b_ih = jax.random.uniform(keys[ki], (h_dim,), jnp.float32, -scale, scale); ki += 1
        b_hh = jax.random.uniform(keys[ki], (h_dim,), jnp.float32, -scale, scale); ki += 1
        layers.append((w_ih, w_hh, b_ih, b_hh))
        d = h_dim
    w_out = jax.random.uniform(keys[ki], (h_dim, out_dim), jnp.float32, -scale, scale); ki += 1
    b_out = jax.random.uniform(keys[ki], (out_dim,), jnp.float32, -scale, scale)
    return layers, w_out, b_out


def reference_forward(x, h_state, params):
    # Pure-JAX mirror of nn.RNN(tanh, batch_first) + nn.Linear.
    layers, w_out, b_out = params
    seq = x
    h_n = []
    for l, (w_ih, w_hh, b_ih, b_hh) in enumerate(layers):
        h = h_state[l]
        hs = []
        for t in range(seq.shape[1]):
            h = jnp.tanh(seq[:, t, :] @ w_ih + b_ih + h @ w_hh + b_hh)
            hs.append(h)
        seq = jnp.stack(hs, axis=1)
        h_n.append(h)
    y = seq @ w_out + b_out
    return y, jnp.stack(h_n, axis=0)


if __name__ == "__main__":
    in_dim, h_dim, out_dim = 16, 32, 16
    n_layers, rollout, batch = 1, 8, 2

    key = jax.random.PRNGKey(0)
    kp, kx = jax.random.split(key)
    params = init_params(kp, in_dim, h_dim, out_dim, n_layers)

    x = jax.random.normal(kx, (batch, rollout, in_dim), jnp.float32)
    h_state = jnp.zeros((n_layers, batch, h_dim), jnp.float32)   # init_hidden (batched)

    y, h_new = high_level_rnn_forward(x, h_state, params)
    jax.block_until_ready((y, h_new))

    y_ref, h_ref = reference_forward(x, h_state, params)
    assert y.shape == (batch, rollout, out_dim)
    assert h_new.shape == (n_layers, batch, h_dim)
    assert jnp.allclose(y, y_ref, atol=1e-5, rtol=1e-5)
    assert jnp.allclose(h_new, h_ref, atol=1e-5, rtol=1e-5)

    print("KERNEL_OK")
</pallas_src>

<mosaic_0001>
module attributes {stable_mosaic.version = 11 : i64} {
  func.func @kernel(%arg0: memref<2x8x16xf32, #tpu.memory_space<vmem>>, %arg1: memref<16x32xf32, #tpu.memory_space<vmem>>, %arg2: memref<32x32xf32, #tpu.memory_space<vmem>>, %arg3: memref<1x32xf32, #tpu.memory_space<vmem>>, %arg4: memref<1x32xf32, #tpu.memory_space<vmem>>, %arg5: memref<32x16xf32, #tpu.memory_space<vmem>>, %arg6: memref<1x16xf32, #tpu.memory_space<vmem>>, %arg7: memref<1x2x32xf32, #tpu.memory_space<vmem>>, %arg8: memref<2x8x16xf32, #tpu.memory_space<vmem>>, %arg9: memref<1x2x32xf32, #tpu.memory_space<vmem>>, %arg10: memref<2x8x32xf32, #tpu.memory_space<vmem>>) attributes {dimension_semantics = [], scalar_prefetch = 0 : i64, scratch_operands = 1 : i64, tpu.core_type = #tpu.core_type<tc>} {
    %c0 = arith.constant 0 : index
    %c0_0 = arith.constant 0 : index
    %c0_1 = arith.constant 0 : index
    %0 = vector.load %arg0[%c0, %c0_0, %c0_1] : memref<2x8x16xf32, #tpu.memory_space<vmem>>, vector<2x8x16xf32>
    %c0_2 = arith.constant 0 : index
    %c0_3 = arith.constant 0 : index
    %1 = vector.load %arg1[%c0_2, %c0_3] : memref<16x32xf32, #tpu.memory_space<vmem>>, vector<16x32xf32>
    %c0_4 = arith.constant 0 : index
    %c0_5 = arith.constant 0 : index
    %2 = vector.load %arg2[%c0_4, %c0_5] : memref<32x32xf32, #tpu.memory_space<vmem>>, vector<32x32xf32>
    %c0_6 = arith.constant 0 : index
    %c0_7 = arith.constant 0 : index
    %3 = vector.load %arg3[%c0_6, %c0_7] : memref<1x32xf32, #tpu.memory_space<vmem>>, vector<1x32xf32>
    %c0_8 = arith.constant 0 : index
    %c0_9 = arith.constant 0 : index
    %4 = vector.load %arg4[%c0_8, %c0_9] : memref<1x32xf32, #tpu.memory_space<vmem>>, vector<1x32xf32>
    %5 = vector.shape_cast %0 : vector<2x8x16xf32> to vector<16x16xf32>
    %cst = arith.constant dense<0.000000e+00> : vector<16x32xf32>
    %6 = tpu.matmul %5, %1, %cst {dimension_numbers = #tpu.dot_dimension_numbers<[1], [0], [0], [1], [0, 0, 1, 1], [], []>} : vector<16x16xf32>, vector<16x32xf32>, vector<16x32xf32> -> vector<16x32xf32>
    %7 = vector.broadcast %3 : vector<1x32xf32> to vector<16x32xf32>
    %8 = arith.addf %6, %7 : vector<16x32xf32>
    %9 = vector.broadcast %4 : vector<1x32xf32> to vector<16x32xf32>
    %10 = arith.addf %8, %9 : vector<16x32xf32>
    %11 = vector.shape_cast %10 : vector<16x32xf32> to vector<2x8x32xf32>
    %c0_10 = arith.constant 0 : index
    %c0_11 = arith.constant 0 : index
    %c0_12 = arith.constant 0 : index
    %12 = vector.load %arg7[%c0_10, %c0_11, %c0_12] : memref<1x2x32xf32, #tpu.memory_space<vmem>>, vector<1x2x32xf32>
    %13 = vector.shape_cast %12 : vector<1x2x32xf32> to vector<2x32xf32>
    %14 = vector.extract_strided_slice %11 {offsets = [0, 0, 0], sizes = [2, 1, 32], strides = [1, 1, 1]} : vector<2x8x32xf32> to vector<2x1x32xf32>
    %15 = vector.shape_cast %14 : vector<2x1x32xf32> to vector<2x32xf32>
    %cst_13 = arith.constant dense<0.000000e+00> : vector<2x32xf32>
    %16 = tpu.matmul %13, %2, %cst_13 {dimension_numbers = #tpu.dot_dimension_numbers<[1], [0], [0], [1], [0, 0, 1, 1], [], []>} : vector<2x32xf32>, vector<32x32xf32>, vector<2x32xf32> -> vector<2x32xf32>
    %17 = arith.addf %15, %16 : vector<2x32xf32>
    %18 = math.tanh %17 : vector<2x32xf32>
    %19 = vector.shape_cast %18 : vector<2x32xf32> to vector<2x1x32xf32>
    %c0_14 = arith.constant 0 : index
    %c0_15 = arith.constant 0 : index
    %c0_16 = arith.constant 0 : index
    %20 = vector.load %arg10[%c0_14, %c0_15, %c0_16] : memref<2x8x32xf32, #tpu.memory_space<vmem>>, vector<2x1x32xf32>
    tpu.vector_store %arg10[%c0_14, %c0_15, %c0_16], %19 {strides = array<i32>} : memref<2x8x32xf32, #tpu.memory_space<vmem>>, vector<2x1x32xf32>,
    %21 = vector.extract_strided_slice %11 {offsets = [0, 1, 0], sizes = [2, 1, 32], strides = [1, 1, 1]} : vector<2x8x32xf32> to vector<2x1x32xf32>
    %22 = vector.shape_cast %21 : vector<2x1x32xf32> to vector<2x32xf32>
    %cst_17 = arith.constant dense<0.000000e+00> : vector<2x32xf32>
    %23 = tpu.matmul %18, %2, %cst_17 {dimension_numbers = #tpu.dot_dimension_numbers<[1], [0], [0], [1], [0, 0, 1, 1], [], []>} : vector<2x32xf32>, vector<32x32xf32>, vector<2x32xf32> -> vector<2x32xf32>
    %24 = arith.addf %22, %23 : vector<2x32xf32>
    %25 = math.tanh %24 : vector<2x32xf32>
    %26 = vector.shape_cast %25 : vector<2x32xf32> to vector<2x1x32xf32>
    %c0_18 = arith.constant 0 : index
    %c1 = arith.constant 1 : index
    %c0_19 = arith.constant 0 : index
    %27 = vector.load %arg10[%c0_18, %c1, %c0_19] : memref<2x8x32xf32, #tpu.memory_space<vmem>>, vector<2x1x32xf32>
    tpu.vector_store %arg10[%c0_18, %c1, %c0_19], %26 {strides = array<i32>} : memref<2x8x32xf32, #tpu.memory_space<vmem>>, vector<2x1x32xf32>,
    %28 = vector.extract_strided_slice %11 {offsets = [0, 2, 0], sizes = [2, 1, 32], strides = [1, 1, 1]} : vector<2x8x32xf32> to vector<2x1x32xf32>
    %29 = vector.shape_cast %28 : vector<2x1x32xf32> to vector<2x32xf32>
    %cst_20 = arith.constant dense<0.000000e+00> : vector<2x32xf32>
    %30 = tpu.matmul %25, %2, %cst_20 {dimension_numbers = #tpu.dot_dimension_numbers<[1], [0], [0], [1], [0, 0, 1, 1], [], []>} : vector<2x32xf32>, vector<32x32xf32>, vector<2x32xf32> -> vector<2x32xf32>
    %31 = arith.addf %29, %30 : vector<2x32xf32>
    %32 = math.tanh %31 : vector<2x32xf32>
    %33 = vector.shape_cast %32 : vector<2x32xf32> to vector<2x1x32xf32>
    %c0_21 = arith.constant 0 : index
    %c2 = arith.constant 2 : index
    %c0_22 = arith.constant 0 : index
    %34 = vector.load %arg10[%c0_21, %c2, %c0_22] : memref<2x8x32xf32, #tpu.memory_space<vmem>>, vector<2x1x32xf32>
    tpu.vector_store %arg10[%c0_21, %c2, %c0_22], %33 {strides = array<i32>} : memref<2x8x32xf32, #tpu.memory_space<vmem>>, vector<2x1x32xf32>,
    %35 = vector.extract_strided_slice %11 {offsets = [0, 3, 0], sizes = [2, 1, 32], strides = [1, 1, 1]} : vector<2x8x32xf32> to vector<2x1x32xf32>
    %36 = vector.shape_cast %35 : vector<2x1x32xf32> to vector<2x32xf32>
    %cst_23 = arith.constant dense<0.000000e+00> : vector<2x32xf32>
    %37 = tpu.matmul %32, %2, %cst_23 {dimension_numbers = #tpu.dot_dimension_numbers<[1], [0], [0], [1], [0, 0, 1, 1], [], []>} : vector<2x32xf32>, vector<32x32xf32>, vector<2x32xf32> -> vector<2x32xf32>
    %38 = arith.addf %36, %37 : vector<2x32xf32>
    %39 = math.tanh %38 : vector<2x32xf32>
    %40 = vector.shape_cast %39 : vector<2x32xf32> to vector<2x1x32xf32>
    %c0_24 = arith.constant 0 : index
    %c3 = arith.constant 3 : index
    %c0_25 = arith.constant 0 : index
    %41 = vector.load %arg10[%c0_24, %c3, %c0_25] : memref<2x8x32xf32, #tpu.memory_space<vmem>>, vector<2x1x32xf32>
    tpu.vector_store %arg10[%c0_24, %c3, %c0_25], %40 {strides = array<i32>} : memref<2x8x32xf32, #tpu.memory_space<vmem>>, vector<2x1x32xf32>,
    %42 = vector.extract_strided_slice %11 {offsets = [0, 4, 0], sizes = [2, 1, 32], strides = [1, 1, 1]} : vector<2x8x32xf32> to vector<2x1x32xf32>
    %43 = vector.shape_cast %42 : vector<2x1x32xf32> to vector<2x32xf32>
    %cst_26 = arith.constant dense<0.000000e+00> : vector<2x32xf32>
    %44 = tpu.matmul %39, %2, %cst_26 {dimension_numbers = #tpu.dot_dimension_numbers<[1], [0], [0], [1], [0, 0, 1, 1], [], []>} : vector<2x32xf32>, vector<32x32xf32>, vector<2x32xf32> -> vector<2x32xf32>
    %45 = arith.addf %43, %44 : vector<2x32xf32>
    %46 = math.tanh %45 : vector<2x32xf32>
    %47 = vector.shape_cast %46 : vector<2x32xf32> to vector<2x1x32xf32>
    %c0_27 = arith.constant 0 : index
    %c4 = arith.constant 4 : index
    %c0_28 = arith.constant 0 : index
    %48 = vector.load %arg10[%c0_27, %c4, %c0_28] : memref<2x8x32xf32, #tpu.memory_space<vmem>>, vector<2x1x32xf32>
    tpu.vector_store %arg10[%c0_27, %c4, %c0_28], %47 {strides = array<i32>} : memref<2x8x32xf32, #tpu.memory_space<vmem>>, vector<2x1x32xf32>,
    %49 = vector.extract_strided_slice %11 {offsets = [0, 5, 0], sizes = [2, 1, 32], strides = [1, 1, 1]} : vector<2x8x32xf32> to vector<2x1x32xf32>
    %50 = vector.shape_cast %49 : vector<2x1x32xf32> to vector<2x32xf32>
    %cst_29 = arith.constant dense<0.000000e+00> : vector<2x32xf32>
    %51 = tpu.matmul %46, %2, %cst_29 {dimension_numbers = #tpu.dot_dimension_numbers<[1], [0], [0], [1], [0, 0, 1, 1], [], []>} : vector<2x32xf32>, vector<32x32xf32>, vector<2x32xf32> -> vector<2x32xf32>
    %52 = arith.addf %50, %51 : vector<2x32xf32>
    %53 = math.tanh %52 : vector<2x32xf32>
    %54 = vector.shape_cast %53 : vector<2x32xf32> to vector<2x1x32xf32>
    %c0_30 = arith.constant 0 : index
    %c5 = arith.constant 5 : index
    %c0_31 = arith.constant 0 : index
    %55 = vector.load %arg10[%c0_30, %c5, %c0_31] : memref<2x8x32xf32, #tpu.memory_space<vmem>>, vector<2x1x32xf32>
    tpu.vector_store %arg10[%c0_30, %c5, %c0_31], %54 {strides = array<i32>} : memref<2x8x32xf32, #tpu.memory_space<vmem>>, vector<2x1x32xf32>,
    %56 = vector.extract_strided_slice %11 {offsets = [0, 6, 0], sizes = [2, 1, 32], strides = [1, 1, 1]} : vector<2x8x32xf32> to vector<2x1x32xf32>
    %57 = vector.shape_cast %56 : vector<2x1x32xf32> to vector<2x32xf32>
    %cst_32 = arith.constant dense<0.000000e+00> : vector<2x32xf32>
    %58 = tpu.matmul %53, %2, %cst_32 {dimension_numbers = #tpu.dot_dimension_numbers<[1], [0], [0], [1], [0, 0, 1, 1], [], []>} : vector<2x32xf32>, vector<32x32xf32>, vector<2x32xf32> -> vector<2x32xf32>
    %59 = arith.addf %57, %58 : vector<2x32xf32>
    %60 = math.tanh %59 : vector<2x32xf32>
    %61 = vector.shape_cast %60 : vector<2x32xf32> to vector<2x1x32xf32>
    %c0_33 = arith.constant 0 : index
    %c6 = arith.constant 6 : index
    %c0_34 = arith.constant 0 : index
    %62 = vector.load %arg10[%c0_33, %c6, %c0_34] : memref<2x8x32xf32, #tpu.memory_space<vmem>>, vector<2x1x32xf32>
    tpu.vector_store %arg10[%c0_33, %c6, %c0_34], %61 {strides = array<i32>} : memref<2x8x32xf32, #tpu.memory_space<vmem>>, vector<2x1x32xf32>,
    %63 = vector.extract_strided_slice %11 {offsets = [0, 7, 0], sizes = [2, 1, 32], strides = [1, 1, 1]} : vector<2x8x32xf32> to vector<2x1x32xf32>
    %64 = vector.shape_cast %63 : vector<2x1x32xf32> to vector<2x32xf32>
    %cst_35 = arith.constant dense<0.000000e+00> : vector<2x32xf32>
    %65 = tpu.matmul %60, %2, %cst_35 {dimension_numbers = #tpu.dot_dimension_numbers<[1], [0], [0], [1], [0, 0, 1, 1], [], []>} : vector<2x32xf32>, vector<32x32xf32>, vector<2x32xf32> -> vector<2x32xf32>
    %66 = arith.addf %64, %65 : vector<2x32xf32>
    %67 = math.tanh %66 : vector<2x32xf32>
    %68 = vector.shape_cast %67 : vector<2x32xf32> to vector<2x1x32xf32>
    %c0_36 = arith.constant 0 : index
    %c7 = arith.constant 7 : index
    %c0_37 = arith.constant 0 : index
    %69 = vector.load %arg10[%c0_36, %c7, %c0_37] : memref<2x8x32xf32, #tpu.memory_space<vmem>>, vector<2x1x32xf32>
    tpu.vector_store %arg10[%c0_36, %c7, %c0_37], %68 {strides = array<i32>} : memref<2x8x32xf32, #tpu.memory_space<vmem>>, vector<2x1x32xf32>,
    %c0_38 = arith.constant 0 : index
    %c0_39 = arith.constant 0 : index
    %c0_40 = arith.constant 0 : index
    %70 = vector.load %arg9[%c0_38, %c0_39, %c0_40] : memref<1x2x32xf32, #tpu.memory_space<vmem>>, vector<1x2x32xf32>
    %71 = vector.shape_cast %70 : vector<1x2x32xf32> to vector<2x32xf32>
    %72 = vector.shape_cast %67 : vector<2x32xf32> to vector<1x2x32xf32>
    tpu.vector_store %arg9[%c0_38, %c0_39, %c0_40], %72 {strides = array<i32>} : memref<1x2x32xf32, #tpu.memory_space<vmem>>, vector<1x2x32xf32>,
    %c0_41 = arith.constant 0 : index
    %c0_42 = arith.constant 0 : index
    %c0_43 = arith.constant 0 : index
    %73 = vector.load %arg10[%c0_41, %c0_42, %c0_43] : memref<2x8x32xf32, #tpu.memory_space<vmem>>, vector<2x8x32xf32>
    %74 = vector.shape_cast %73 : vector<2x8x32xf32> to vector<16x32xf32>
    %c0_44 = arith.constant 0 : index
    %c0_45 = arith.constant 0 : index
    %75 = vector.load %arg5[%c0_44, %c0_45] : memref<32x16xf32, #tpu.memory_space<vmem>>, vector<32x16xf32>
    %cst_46 = arith.constant dense<0.000000e+00> : vector<16x16xf32>
    %76 = tpu.matmul %74, %75, %cst_46 {dimension_numbers = #tpu.dot_dimension_numbers<[1], [0], [0], [1], [0, 0, 1, 1], [], []>} : vector<16x32xf32>, vector<32x16xf32>, vector<16x16xf32> -> vector<16x16xf32>
    %c0_47 = arith.constant 0 : index
    %c0_48 = arith.constant 0 : index
    %77 = vector.load %arg6[%c0_47, %c0_48] : memref<1x16xf32, #tpu.memory_space<vmem>>, vector<1x16xf32>
    %78 = vector.broadcast %77 : vector<1x16xf32> to vector<16x16xf32>
    %79 = arith.addf %76, %78 : vector<16x16xf32>
    %80 = vector.shape_cast %79 : vector<16x16xf32> to vector<2x8x16xf32>
    %c0_49 = arith.constant 0 : index
    %c0_50 = arith.constant 0 : index
    %c0_51 = arith.constant 0 : index
    %81 = vector.load %arg8[%c0_49, %c0_50, %c0_51] : memref<2x8x16xf32, #tpu.memory_space<vmem>>, vector<2x8x16xf32>
    tpu.vector_store %arg8[%c0_49, %c0_50, %c0_51], %80 {strides = array<i32>} : memref<2x8x16xf32, #tpu.memory_space<vmem>>, vector<2x8x16xf32>,
    return
  }
}

</mosaic_0001>

<bundles_post_ra>
// kernel: tpu_custom_call.1
= control target key start
LH: loop header
LB: loop body
LE: loop exit
PB: predicated region body
PF: predicated region fallthrough
CT: control target
= control target key end

     0   :  { %15 = vsyncpa [#allocation4], 0  ;;  %s826_s0 = inlined_call_operand.vmem [shape: f32[2,8,16], index: 0, kind: input, shape index: {}]   ;;  %s827_s1 = inlined_call_operand.hbm [shape: f32[16,32], index: 1, kind: input, shape index: {}]   ;;  %s828_s2 = inlined_call_operand.vmem [shape: f32[32,32], index: 2, kind: input, shape index: {}]   ;;  %s829_s3 = inlined_call_operand.hbm [shape: f32[1,32], index: 3, kind: input, shape index: {}]   ;;  %s830_s4 = inlined_call_operand.vmem [shape: f32[1,32], index: 4, kind: input, shape index: {}]   ;;  %s831_s5 = inlined_call_operand.vmem [shape: f32[32,16], index: 5, kind: input, shape index: {}]   ;;  %s832_s6 = inlined_call_operand.vmem [shape: f32[1,16], index: 6, kind: input, shape index: {}]   ;;  %s833_s7 = inlined_call_operand.vmem [shape: f32[1,2,32], index: 7, kind: input, shape index: {}]   ;;  %s834_s8 = inlined_call_operand.hbm [shape: f32[2,8,16], index: 8, kind: output, shape index: {0}]   ;;  %s835_s9 = inlined_call_operand.hbm [shape: f32[1,2,32], index: 9, kind: output, shape index: {1}]  }
   0x1   :  { %16 = vsyncpa [#allocation7], 0 }
   0x2   :  { %17 = vsyncpa [#allocation5], 0 }
   0x3   :  { %18 = vsyncpa [#allocation10], 0  ;;  %s25_s11 = sshll.u32 %s827_s1, 4  ;;  %s659_s12 = smov [#allocation3]   ;;  %s26_s11 = int_to_ptr.hbm [resolvable:$true] %s25_s11 }
   0x4   :  { %s27_s13 = sshll.u32 %s659_s12, 4  ;;  %s41_s16 = sshll.u32 %s829_s3, 4  ;;  %s28_s13 = int_to_ptr.vmem [resolvable:$true] %s27_s13  ;;  %s42_s16 = int_to_ptr.hbm [resolvable:$true] %s41_s16 }
   0x5   :  { %s660_s17 = smov 128   ;;  %s661_s18 = smov 8  }
   0x6   :  { %33 = dma.hbm_to_vmem [thread:$0]  %s26_s11, 256, %s28_s13, [#allocation4], %s660_s17, %s660_s17, %s661_s18  }
   0x7   :  { %s662_s19 = smov [#allocation6]  }
   0x8   :  { %s43_s20 = sshll.u32 %s662_s19, 4  ;;  %s44_s20 = int_to_ptr.vmem [resolvable:$true] %s43_s20 }
   0x9   :  { %46 = dma.hbm_to_vmem [thread:$0]  %s42_s16, 16, %s44_s20, [#allocation7]  }
   0xa   :  { %651 = dma.done.wait [#allocation4], 256  }
   0xb   :  { %652 = vsyncadd [#allocation4], 4294967040 }
   0xc   :  { %653 = dma.done.wait [#allocation7], 16  }
   0xd   :  { %654 = vsyncadd [#allocation7], 4294967280  ;;  %v66_v0 = vld [vmem:[#allocation3 + $0x8] sm:$0xff]  ;;  %v65_v2 = vld [vmem:[#allocation3] sm:$0xff]  ;;  %vm76_vm0 = vcmask 130048   ;;  %vm112_vm1 = vcmask 261120  }
   0xe   :  { %v727_v1 = vld [vmem:[%s828_s2 + $0x18] sm:$0xff]  ;;  %97 = vmatpush.msra.mxu0 %v66_v0  ;;  %v69_v3 = vld [vmem:[%s828_s2 + $0x10] sm:$0xff]  ;;  %v63_v4 = vld [vmem:[%s826_s0] sm:$0xff]  ;;  %vm144_vm2 = vcmask 253952   ;;  %vm150_vm3 = vcmask 1041409   ;;  %vm182_vm4 = vcmask 254977  }
   0xf   :  { %128 = vmatpush.msra.mxu1 %v727_v1  ;;  %v68_v5 = vld [vmem:[%s828_s2 + $0x8] sm:$0xff]  ;;  %166 = vmatpush.msra.mxu3 %v727_v1  ;;  %v67_v6 = vld [vmem:[%s828_s2] sm:$0xff]  ;;  %vm220_vm5 = vcmask 256002   ;;  %vm259_vm6 = vcmask 257027   ;;  %vm298_vm7 = vcmask 258052   ;;  %vm337_vm8 = vcmask 259077  }
  0x10   :  { %281 = vmatpush.msra.mxu2 %v727_v1  ;;  %98 = vmatpush.msra.mxu0 %v65_v2  ;;  %v111_v7 = vld [vmem:[%s833_s7] sm:$0x3]  ;;  %v64_v8 = vld [vmem:[%s826_s0 + $0x8] sm:$0xff]  ;;  %vm376_vm9 = vcmask 260102   ;;  %vm415_vm10 = vcmask 261127   ;;  %s486_s3 = sshll.u32 %s835_s9, 4  ;;  %s487_s3 = int_to_ptr.hbm [resolvable:$true] %s486_s3 }
  0x11   :  { %129 = vmatpush.msra.mxu1 %v69_v3  ;;  %502 = vmatmul.msk.f32.vlgmr.msra.gmra.mxu0 %vm76_vm0, %v63_v4  ;;  %v520_v9 = vld [vmem:[#allocation6] ss:$0 sm:$0xff]  ;;  %s664_s24 = smov [#allocation8]   ;;  %s472_s28 = sshll.u32 %s834_s8, 4  ;;  %s473_s28 = int_to_ptr.hbm [resolvable:$true] %s472_s28 }
  0x12   :  { %167 = vmatpush.msra.mxu3 %v69_v3  ;;  %282 = vmatpush.msra.mxu2 %v69_v3  ;;  %v521_v10 = vld [vmem:[%s830_s4] ss:$0 sm:$0xff]  ;;  %s470_s25 = sshll.u32 %s664_s24, 4  ;;  %s471_s25 = int_to_ptr.vmem [resolvable:$true] %s470_s25 }
  0x13   :  { %130 = vmatpush.msra.mxu1 %v68_v5  ;;  %359 = vmatpush.msrb.mxu0 %v727_v1 }
  0x14   :  { %168 = vmatpush.msra.mxu3 %v68_v5  ;;  %283 = vmatpush.msra.mxu2 %v68_v5 }
  0x15   :  { %131 = vmatpush.msra.mxu1 %v67_v6  ;;  %360 = vmatpush.msrb.mxu0 %v69_v3 }
  0x16   :  { %504 = vmatmul.msk.f32.vlgmr.msra.gmra.mxu1 %vm112_vm1, %v111_v7  ;;  %169 = vmatpush.msra.mxu3 %v67_v6 }
  0x17   :  { %242 = vmatpush.msrb.mxu1 %v727_v1  ;;  %284 = vmatpush.msra.mxu2 %v67_v6 }
  0x18   :  { %203 = vmatpush.msrb.mxu3 %v727_v1  ;;  %361 = vmatpush.msrb.mxu0 %v68_v5 }
  0x19   :  { %243 = vmatpush.msrb.mxu1 %v69_v3  ;;  %503 = vmatmul.msk.f32.gmra.mxu0 %vm76_vm0, %v64_v8 }
  0x1a   :  { %204 = vmatpush.msrb.mxu3 %v69_v3  ;;  %362 = vmatpush.msrb.mxu0 %v67_v6 }
  0x1b   :  { %244 = vmatpush.msrb.mxu1 %v68_v5 }
  0x1c   :  { %205 = vmatpush.msrb.mxu3 %v68_v5 }
  0x1d   :  { %245 = vmatpush.msrb.mxu1 %v67_v6 }
  0x1e   :  { %206 = vmatpush.msrb.mxu3 %v67_v6 }
  0x1f   :  { %398 = vmatpush.msra.mxu1 %v727_v1 }
  0x21   :  { %399 = vmatpush.msra.mxu1 %v69_v3 }
  0x23   :  { %400 = vmatpush.msra.mxu1 %v68_v5 }
  0x25   :  { %401 = vmatpush.msra.mxu1 %v67_v6 }
  0x8e   :  { %v100_v11 = vpop.f32.mrf.mxu0 }
  0x8f   :  { %v101_v12 = vadd.f32 %v520_v9, %v100_v11 }
  0x91   :  { %v760_v13 = vadd.f32 %v521_v10, %v101_v12 }
  0x93   :  { %v133_v14 = vpop.f32.mrf.mxu1 }
  0x94   :  { %v140_v15 = vadd.f32 %v133_v14, %v760_v13  ;;  %v137_v17 = vrot.slane %v133_v14, 1 }
  0x96   :  { %523 = vtanh.f32 %v140_v15  ;;  %v103_v16 = vpop.f32.mrf.mxu0 }
  0x97   :  { %v104_v18 = vadd.f32 %v520_v9, %v103_v16 }
  0x99   :  { %v763_v19 = vadd.f32 %v521_v10, %v104_v18 }
  0x9b   :  { %v141_v21 = vadd.f32 %v137_v17, %v763_v19 }
  0x9c   :  { %v524_v20 = vpop.eup %523 }
  0x9d   :  { %145 = vst.msk [vmem:[#allocation2] sm:$0x1] %vm144_vm2, %v524_v20  ;;  %525 = vtanh.f32 %v141_v21  ;;  %v430_v21 = vld [vmem:[%s831_s5 + $0x18] sm:$0xff] }
  0x9e   :  { %453 = vmatpush.msrb.mxu2 %v430_v21 }
  0xa3   :  { %v526_v22 = vpop.eup %525 }
  0xa4   :  { %146 = vst.msk [vmem:[#allocation2 + $0x8] sm:$0x1] %vm144_vm2, %v526_v22  ;;  %v149_v23 = vrot.slane %v526_v22, 7  ;;  %v429_v22 = vld [vmem:[%s831_s5 + $0x10] sm:$0xff] }
  0xa5   :  { %454 = vmatpush.msrb.mxu2 %v429_v22 }
  0xa6   :  { %v151_v24 = vsel %vm150_vm3, %v149_v23, %v524_v20  ;;  %v428_v23 = vld [vmem:[%s831_s5 + $0x8] sm:$0xff] }
  0xa7   :  { %505 = vmatmul.msk.f32.vlgmr.msra.gmra.mxu3 %vm112_vm1, %v151_v24  ;;  %v427_v24 = vld [vmem:[%s831_s5] sm:$0xff]  ;;  %455 = vmatpush.msrb.mxu2 %v428_v23  ;;  %s663_s5 = smov [#allocation9]  }
  0xa8   :  { %320 = vmatpush.msra.mxu3 %v727_v1  ;;  %s484_s20 = sshll.u32 %s663_s5, 4  ;;  %s485_s20 = int_to_ptr.vmem [resolvable:$true] %s484_s20 }
  0xa9   :  { %456 = vmatpush.msrb.mxu2 %v427_v24 }
  0xaa   :  { %321 = vmatpush.msra.mxu3 %v69_v3 }
  0xac   :  { %322 = vmatpush.msra.mxu3 %v68_v5 }
  0xae   :  { %323 = vmatpush.msra.mxu3 %v67_v6 }
 0x12a   :  { %v171_v25 = vpop.f32.mrf.mxu3 }
 0x12b   :  { %v175_v26 = vrot.slane %v171_v25, 7  ;;  %v179_v27 = vadd.f32 %v171_v25, %v763_v19 }
 0x12d   :  { %v178_v28 = vadd.f32 %v175_v26, %v760_v13  ;;  %527 = vtanh.f32 %v179_v27 }
 0x12f   :  { %529 = vtanh.f32 %v178_v28 }
 0x133   :  { %v528_v29 = vpop.eup %527 }
 0x134   :  { %184 = vst.msk [vmem:[#allocation2 + $0x8] sm:$0x2] %vm182_vm4, %v528_v29 }
 0x135   :  { %v530_v30 = vpop.eup %529 }
 0x136   :  { %183 = vst.msk [vmem:[#allocation2] sm:$0x2] %vm182_vm4, %v530_v30  ;;  %v187_v31 = vrot.slane %v530_v30, 1 }
 0x138   :  { %v188_v32 = vsel %vm150_vm3, %v528_v29, %v187_v31 }
 0x139   :  { %506 = vmatmul.msk.f32.vlgmr.msrb.gmra.mxu3 %vm112_vm1, %v188_v32 }
 0x1bc   :  { %v208_v33 = vpop.f32.mrf.mxu3 }
 0x1bd   :  { %v212_v34 = vrot.slane %v208_v33, 6  ;;  %v213_v35 = vrot.slane %v208_v33, 7 }
 0x1bf   :  { %v216_v36 = vadd.f32 %v212_v34, %v760_v13  ;;  %v217_v37 = vadd.f32 %v213_v35, %v763_v19 }
 0x1c1   :  { %531 = vtanh.f32 %v216_v36 }
 0x1c2   :  { %533 = vtanh.f32 %v217_v37 }
 0x1c7   :  { %v532_v38 = vpop.eup %531 }
 0x1c8   :  { %v534_v39 = vpop.eup %533  ;;  %221 = vst.msk [vmem:[#allocation2] sm:$0x4] %vm220_vm5, %v532_v38  ;;  %v225_v40 = vrot.slane %v532_v38, 2 }
 0x1c9   :  { %222 = vst.msk [vmem:[#allocation2 + $0x8] sm:$0x4] %vm220_vm5, %v534_v39  ;;  %v226_v41 = vrot.slane %v534_v39, 1 }
 0x1cb   :  { %v227_v42 = vsel %vm150_vm3, %v226_v41, %v225_v40 }
 0x1cc   :  { %507 = vmatmul.msk.f32.vlgmr.msrb.gmra.mxu1 %vm112_vm1, %v227_v42 }
 0x249   :  { %v247_v43 = vpop.f32.mrf.mxu1 }
 0x24a   :  { %v251_v44 = vrot.slane %v247_v43, 5  ;;  %v252_v45 = vrot.slane %v247_v43, 6 }
 0x24c   :  { %v255_v46 = vadd.f32 %v251_v44, %v760_v13  ;;  %v256_v47 = vadd.f32 %v252_v45, %v763_v19 }
 0x24e   :  { %535 = vtanh.f32 %v255_v46 }
 0x24f   :  { %537 = vtanh.f32 %v256_v47 }
 0x254   :  { %v536_v48 = vpop.eup %535 }
 0x255   :  { %v538_v49 = vpop.eup %537  ;;  %260 = vst.msk [vmem:[#allocation2] sm:$0x8] %vm259_vm6, %v536_v48  ;;  %v264_v50 = vrot.slane %v536_v48, 3 }
 0x256   :  { %261 = vst.msk [vmem:[#allocation2 + $0x8] sm:$0x8] %vm259_vm6, %v538_v49  ;;  %v265_v51 = vrot.slane %v538_v49, 2 }
 0x258   :  { %v266_v52 = vsel %vm150_vm3, %v265_v51, %v264_v50 }
 0x259   :  { %508 = vmatmul.msk.f32.vlgmr.msra.gmra.mxu2 %vm112_vm1, %v266_v52 }
 0x2dc   :  { %v286_v53 = vpop.f32.mrf.mxu2 }
 0x2dd   :  { %v290_v54 = vrot.slane %v286_v53, 4  ;;  %v291_v55 = vrot.slane %v286_v53, 5 }
 0x2df   :  { %v294_v56 = vadd.f32 %v290_v54, %v760_v13  ;;  %v295_v57 = vadd.f32 %v291_v55, %v763_v19 }
 0x2e1   :  { %539 = vtanh.f32 %v294_v56 }
 0x2e2   :  { %541 = vtanh.f32 %v295_v57 }
 0x2e7   :  { %v540_v58 = vpop.eup %539 }
 0x2e8   :  { %v542_v59 = vpop.eup %541  ;;  %299 = vst.msk [vmem:[#allocation2] sm:$0x10] %vm298_vm7, %v540_v58  ;;  %v303_v60 = vrot.slane %v540_v58, 4 }
 0x2e9   :  { %300 = vst.msk [vmem:[#allocation2 + $0x8] sm:$0x10] %vm298_vm7, %v542_v59  ;;  %v304_v61 = vrot.slane %v542_v59, 3 }
 0x2eb   :  { %v305_v62 = vsel %vm150_vm3, %v304_v61, %v303_v60 }
 0x2ec   :  { %509 = vmatmul.msk.f32.vlgmr.msra.gmra.mxu3 %vm112_vm1, %v305_v62 }
 0x36f   :  { %v325_v63 = vpop.f32.mrf.mxu3 }
 0x370   :  { %v329_v0 = vrot.slane %v325_v63, 3  ;;  %v330_v1 = vrot.slane %v325_v63, 4 }
 0x372   :  { %v333_v2 = vadd.f32 %v329_v0, %v760_v13  ;;  %v334_v3 = vadd.f32 %v330_v1, %v763_v19 }
 0x374   :  { %543 = vtanh.f32 %v333_v2 }
 0x375   :  { %545 = vtanh.f32 %v334_v3 }
 0x37a   :  { %v544_v4 = vpop.eup %543 }
 0x37b   :  { %v546_v5 = vpop.eup %545  ;;  %338 = vst.msk [vmem:[#allocation2] sm:$0x20] %vm337_vm8, %v544_v4  ;;  %v342_v6 = vrot.slane %v544_v4, 5 }
 0x37c   :  { %339 = vst.msk [vmem:[#allocation2 + $0x8] sm:$0x20] %vm337_vm8, %v546_v5  ;;  %v343_v7 = vrot.slane %v546_v5, 4 }
 0x37e   :  { %v344_v8 = vsel %vm150_vm3, %v343_v7, %v342_v6 }
 0x37f   :  { %510 = vmatmul.msk.f32.vlgmr.msrb.gmra.mxu0 %vm112_vm1, %v344_v8 }
 0x3fc   :  { %v364_v9 = vpop.f32.mrf.mxu0 }
 0x3fd   :  { %v368_v10 = vrot.slane %v364_v9, 2  ;;  %v369_v11 = vrot.slane %v364_v9, 3 }
 0x3ff   :  { %v372_v12 = vadd.f32 %v368_v10, %v760_v13  ;;  %v373_v14 = vadd.f32 %v369_v11, %v763_v19 }
 0x401   :  { %547 = vtanh.f32 %v372_v12 }
 0x402   :  { %549 = vtanh.f32 %v373_v14 }
 0x407   :  { %v548_v15 = vpop.eup %547 }
 0x408   :  { %v550_v16 = vpop.eup %549  ;;  %377 = vst.msk [vmem:[#allocation2] sm:$0x40] %vm376_vm9, %v548_v15  ;;  %v381_v17 = vrot.slane %v548_v15, 6 }
 0x409   :  { %378 = vst.msk [vmem:[#allocation2 + $0x8] sm:$0x40] %vm376_vm9, %v550_v16  ;;  %v382_v18 = vrot.slane %v550_v16, 5 }
 0x40b   :  { %v383_v20 = vsel %vm150_vm3, %v382_v18, %v381_v17 }
 0x40c   :  { %511 = vmatmul.msk.f32.vlgmr.msra.gmra.mxu1 %vm112_vm1, %v383_v20 }
 0x489   :  { %v403_v25 = vpop.f32.mrf.mxu1 }
 0x48a   :  { %v407_v26 = vrot.slane %v403_v25, 1  ;;  %v408_v27 = vrot.slane %v403_v25, 2 }
 0x48c   :  { %v411_v28 = vadd.f32 %v407_v26, %v760_v13  ;;  %v412_v29 = vadd.f32 %v408_v27, %v763_v19  ;;  %v522_v13 = vld [vmem:[%s832_s6] ss:$0 sm:$0xff] }
 0x48e   :  { %551 = vtanh.f32 %v411_v28 }
 0x48f   :  { %553 = vtanh.f32 %v412_v29 }
 0x494   :  { %v552_v30 = vpop.eup %551 }
 0x495   :  { %v554_v31 = vpop.eup %553  ;;  %416 = vst.msk [vmem:[#allocation2] sm:$0x80] %vm415_vm10, %v552_v30 }
 0x496   :  { %417 = vst.msk [vmem:[#allocation2 + $0x8] sm:$0x80] %vm415_vm10, %v554_v31  ;;  %v420_v32 = vrot.slane %v554_v31, 7 }
 0x497   :  { %423 = vst.msk [vmem:[#allocation9 - $0x7] sm:$0x80] %vm415_vm10, %v552_v30 }
 0x498   :  { %424 = vst.msk [vmem:[#allocation9 + $0x1] sm:$0x1] %vm144_vm2, %v420_v32 }
 0x499   :  { %489 = dma.vmem_to_hbm [thread:$0]  %s485_s20, 32, %s487_s3, [#allocation10]  }
 0x49c   :  { %v425_v33 = vld [vmem:[#allocation2] sm:$0xff] }
 0x49d   :  { %512 = vmatmul.msk.f32.vlgmr.msrb.gmra.mxu2 %vm112_vm1, %v425_v33  ;;  %v426_v34 = vld [vmem:[#allocation2 + $0x8] sm:$0xff] }
 0x4a5   :  { %513 = vmatmul.msk.f32.gmra.mxu2 %vm112_vm1, %v426_v34 }
 0x520   :  { %v458_v19 = vpop.f32.mrf.mxu2 }
 0x521   :  { %v459_v35 = vadd.f32 %v522_v13, %v458_v19 }
 0x523   :  { %464 = vst.msk [vmem:[#allocation8] sm:$0xff] %vm76_vm0, %v459_v35 }
 0x528   :  { %v461_v36 = vpop.f32.mrf.mxu2 }
 0x529   :  { %v462_v37 = vadd.f32 %v522_v13, %v461_v36 }
 0x52b   :  { %465 = vst.msk [vmem:[#allocation8 + $0x8] sm:$0xff] %vm76_vm0, %v462_v37 }
 0x52c   :  { %478 = dma.vmem_to_hbm [thread:$0]  %s471_s25, 256, %s473_s28, [#allocation5], %s660_s17, %s660_s17, %s661_s18  }
 0x52d   :  { %655 = dma.done.wait [#allocation5], 256  }
 0x52e   :  { %656 = vsyncadd [#allocation5], 4294967040 }
 0x52f   :  { %657 = dma.done.wait [#allocation10], 32  }
 0x530   :  { %658 = vsyncadd [#allocation10], 4294967264 }
 0x531   :  { %498 = vsyncpa [#allocation4], 1 }
 0x532   :  { %499 = vsyncpa [#allocation7], 1 }
 0x533   :  { %500 = vsyncpa [#allocation5], 1 }
 0x534   :  { %501 = vsyncpa [#allocation10], 1 }

</bundles_post_ra>
